<compile_context>
chip_gen: v7x
topology: tpu7x:2x2x1
jax: 0.10.0
libtpu: 0.0.40
codegen_flags: <defaults>
</compile_context>

<pallas_src>
import functools

import jax
import jax.numpy as jnp
from jax.experimental import pallas as pl
from jax.experimental.pallas import tpu as pltpu


LANE = 128     # vreg lane width  -> last-dim alignment unit
SUBLANE = 8    # vreg sublane count -> second-to-last-dim alignment unit


def _cdiv(a, b):
    return -(-a // b)


def _round_up(v, m):
    return ((v + m - 1) // m) * m


def _pad2(a, rows, cols):
    return jnp.pad(a, ((0, rows - a.shape[0]), (0, cols - a.shape[1])))


# ---------------------------------------------------------------------------
# Kernel
# ---------------------------------------------------------------------------
def ae_kernel(x_ref,
              w1_ref, b1_ref,
              w2a_ref, b2a_ref,
              w2b_ref, b2b_ref,
              w3_ref, b3_ref,
              w4_ref, b4_ref,
              out_ref):
    """One batch tile of the full encode+decode chain.

    5 MXU matmuls (bf16 operands, f32 accumulation) + f32 bias adds + 4 ReLUs.
    Weights/biases are VMEM-resident across grid steps (constant index maps);
    only the x/out batch tiles move through the auto-pipelined DMA.
    """
    cdt = w1_ref.dtype  # compute dtype for MXU operands (bf16)

    def layer(h, w_ref, b_ref, relu):
        acc = jnp.dot(h, w_ref[...], preferred_element_type=jnp.float32) + b_ref[...]
        if relu:
            acc = jnp.maximum(acc, 0.0).astype(cdt)
        return acc

    # x arrives unpadded f32; cast to bf16 in-kernel (no extra HBM pass).
    h = x_ref[...].astype(cdt)
    # encode
    h = layer(h, w1_ref, b1_ref, relu=True)
    h = layer(h, w2a_ref, b2a_ref, relu=True)
    h = layer(h, w2b_ref, b2b_ref, relu=True)
    # decode
    h = layer(h, w3_ref, b3_ref, relu=True)
    out = layer(h, w4_ref, b4_ref, relu=False)

    out_ref[...] = out.astype(out_ref.dtype)


# ---------------------------------------------------------------------------
# One-time parameter preparation (pad to lane-aligned shapes, cast to bf16)
# ---------------------------------------------------------------------------
_PARAM_ORDER = ("w1", "b1", "w2a", "b2a", "w2b", "b2b", "w3", "b3", "w4", "b4")


def prepare_params(params, compute_dtype=jnp.bfloat16):
    """Pad weights/biases to 128-lane-aligned shapes and cast weights to bf16.

    Runs once at init; ae_forward then takes these prepared arrays directly so
    no pad/cast ops run in the per-call path.
    """
    input_size, hidden_size = params["w1"].shape
    latent_size = params["w2a"].shape[1]
    in_p = _round_up(input_size, LANE)
    hid_p = _round_up(hidden_size, LANE)
    lat_p = _round_up(latent_size, LANE)

    prep = {
        # w1 keeps its unpadded row count (== input_size): K=64 is fine on the
        # MXU and it matches the unpadded x tile fed to the kernel.
        "w1":  _pad2(params["w1"], input_size, hid_p).astype(compute_dtype),
        "b1":  _pad2(params["b1"], 1, hid_p).astype(jnp.float32),
        "w2a": _pad2(params["w2a"], hid_p, lat_p).astype(compute_dtype),
        "b2a": _pad2(params["b2a"], 1, lat_p).astype(jnp.float32),
        "w2b": _pad2(params["w2b"], lat_p, lat_p).astype(compute_dtype),
        "b2b": _pad2(params["b2b"], 1, lat_p).astype(jnp.float32),
        "w3":  _pad2(params["w3"], lat_p, hid_p).astype(compute_dtype),
        "b3":  _pad2(params["b3"], 1, hid_p).astype(jnp.float32),
        "w4":  _pad2(params["w4"], hid_p, in_p).astype(compute_dtype),
        "b4":  _pad2(params["b4"], 1, in_p).astype(jnp.float32),
        "input_size": input_size,
    }
    return prep


# ---------------------------------------------------------------------------
# Probe: can resident operands be single-buffered on this JAX version?
# ---------------------------------------------------------------------------
def _probe_copy_kernel(a_ref, o_ref):
    o_ref[...] = a_ref[...]


@functools.lru_cache(maxsize=1)
def _single_buffer_supported():
    try:
        fn = pl.pallas_call(
            _probe_copy_kernel,
            out_shape=jax.ShapeDtypeStruct((SUBLANE, LANE), jnp.float32),
            grid=(1,),
            in_specs=[pl.BlockSpec((SUBLANE, LANE), lambda i: (0, 0),
                                   pipeline_mode=pl.Buffered(1))],
            out_specs=pl.BlockSpec((SUBLANE, LANE), lambda i: (0, 0)),
        )
        jax.block_until_ready(jax.jit(fn)(jnp.zeros((SUBLANE, LANE), jnp.float32)))
        return True
    except Exception:
        return False


# ---------------------------------------------------------------------------
# Forward
# ---------------------------------------------------------------------------
def _compute_tiling(batch, block_batch):
    """Pick (tile_batch, n_steps). Single step when batch fits; otherwise keep
    the step count even when possible so v7x's two TCs split evenly."""
    tb = _round_up(min(block_batch, _round_up(batch, SUBLANE)), SUBLANE)
    n_steps = _cdiv(batch, tb)
    if n_steps > 1 and n_steps % 2 == 1:
        tb_even = _round_up(_cdiv(batch, n_steps + 1), SUBLANE)
        if tb_even > 0 and _cdiv(batch, tb_even) % 2 == 0:
            tb = tb_even
            n_steps = _cdiv(batch, tb)
    return tb, n_steps


@functools.partial(jax.jit, static_argnames=("tb", "n_steps", "single_buffer"))
def _ae_call(x, prep, *, tb, n_steps, single_buffer):
    B, input_size = x.shape
    hid_p = prep["w1"].shape[1]
    lat_p = prep["w2a"].shape[1]
    in_p = prep["w4"].shape[1]

    def resident(shape):
        # Constant block index across the whole grid -> stays VMEM-resident;
        # single-buffer it when supported (no second prefetch, less VMEM).
        if single_buffer:
            return pl.BlockSpec(shape, lambda i: (0, 0),
                                pipeline_mode=pl.Buffered(1))
        return pl.BlockSpec(shape, lambda i: (0, 0))

    weight_args = [prep[k] for k in _PARAM_ORDER]

    flops = 2 * tb * n_steps * (input_size * hid_p + hid_p * lat_p
                                + lat_p * lat_p + lat_p * hid_p + hid_p * in_p)
    bytes_accessed = (B * input_size * x.dtype.itemsize
                      + sum(a.size * a.dtype.itemsize for a in weight_args)
                      + B * in_p * x.dtype.itemsize)

    # Batch tiles that overrun B (ragged last tile) read unspecified rows and
    # have their out-of-range output rows dropped by the writeback DMA; rows
    # are independent in an MLP, so this is safe.
    out_p = pl.pallas_call(
        ae_kernel,
        out_shape=jax.ShapeDtypeStruct((B, in_p), x.dtype),
        grid=(n_steps,),
        in_specs=[
            # Unpadded x: block last dim == full array dim, so (8,128) rule ok.
            pl.BlockSpec((tb, input_size), lambda i: (i, 0)),
            resident(prep["w1"].shape), resident(prep["b1"].shape),
            resident(prep["w2a"].shape), resident(prep["b2a"].shape),
            resident(prep["w2b"].shape), resident(prep["b2b"].shape),
            resident(prep["w3"].shape), resident(prep["b3"].shape),
            resident(prep["w4"].shape), resident(prep["b4"].shape),
        ],
        # Output padded to 128 lanes -> lane-dense (unmasked) stores.
        out_specs=pl.BlockSpec((tb, in_p), lambda i: (i, 0)),
        compiler_params=pltpu.CompilerParams(
            dimension_semantics=("parallel",)),
        cost_estimate=pl.CostEstimate(
            flops=flops, transcendentals=0, bytes_accessed=bytes_accessed),
    )(x, *weight_args)

    return out_p[:, :input_size]


def ae_forward(x, prep, *, block_batch=2048):
    """x: (B, input_size) f32. prep: output of prepare_params()."""
    B = x.shape[0]
    tb, n_steps = _compute_tiling(B, block_batch)
    return _ae_call(x, prep, tb=tb, n_steps=n_steps,
                    single_buffer=_single_buffer_supported())


# ---------------------------------------------------------------------------
# Init + references
# ---------------------------------------------------------------------------
def init_linear(key, in_features, out_features):
    """PyTorch-style uniform(-1/sqrt(in), 1/sqrt(in)) init.
    Weight returned already transposed to (in, out); bias as (1, out)."""
    kw, kb = jax.random.split(key)
    bound = 1.0 / jnp.sqrt(jnp.float32(in_features))
    w = jax.random.uniform(kw, (in_features, out_features), jnp.float32, -bound, bound)
    b = jax.random.uniform(kb, (1, out_features), jnp.float32, -bound, bound)
    return w, b


def ae_reference_f32(x, params):
    """Exact (f32) forward semantics of the PyTorch module."""
    relu = lambda v: jnp.maximum(v, 0.0)
    h1 = relu(x @ params["w1"] + params["b1"])
    h2 = relu(h1 @ params["w2a"] + params["b2a"])
    h3 = relu(h2 @ params["w2b"] + params["b2b"])
    d1 = relu(h3 @ params["w3"] + params["b3"])
    return d1 @ params["w4"] + params["b4"]


def ae_reference_bf16(x, params):
    """Mirrors the kernel's bf16-operand / f32-accumulate arithmetic."""
    cdt = jnp.bfloat16

    def layer(h, w, b, relu):
        y = jnp.dot(h, w.astype(cdt), preferred_element_type=jnp.float32) + b
        if relu:
            y = jnp.maximum(y, 0.0).astype(cdt)
        return y

    h = x.astype(cdt)
    h = layer(h, params["w1"], params["b1"], True)
    h = layer(h, params["w2a"], params["b2a"], True)
    h = layer(h, params["w2b"], params["b2b"], True)
    h = layer(h, params["w3"], params["b3"], True)
    return layer(h, params["w4"], params["b4"], False)


if __name__ == "__main__":
    input_size, hidden_size, latent_size = 64, 32, 16

    root = jax.random.PRNGKey(0)
    kx, kx2, k1, k2a, k2b, k3, k4 = jax.random.split(root, 7)

    w1, b1 = init_linear(k1, input_size, hidden_size)
    w2a, b2a = init_linear(k2a, hidden_size, latent_size)
    w2b, b2b = init_linear(k2b, latent_size, latent_size)
    w3, b3 = init_linear(k3, latent_size, hidden_size)
    w4, b4 = init_linear(k4, hidden_size, input_size)
    params = {"w1": w1, "b1": b1, "w2a": w2a, "b2a": b2a,
              "w2b": w2b, "b2b": b2b, "w3": w3, "b3": b3,
              "w4": w4, "b4": b4}

    prep = prepare_params(params)   # pad + bf16-cast once, outside the hot path

    # Small smoke test at the module's implied shapes (batch=2, single step).
    x_small = jax.random.normal(kx, (2, input_size), jnp.float32)
    out_small = jax.block_until_ready(ae_forward(x_small, prep))
    assert out_small.shape == (2, input_size)
    assert jnp.allclose(out_small, ae_reference_bf16(x_small, params),
                        atol=5e-3, rtol=5e-3), "mismatch vs bf16 reference"
    assert jnp.allclose(out_small, ae_reference_f32(x_small, params),
                        atol=5e-2, rtol=5e-2), "mismatch vs f32 reference"

    # Ragged batch, default tiling: fits in one grid step (300 <= 2048).
    x_big = jax.random.normal(kx2, (300, input_size), jnp.float32)
    out_big = jax.block_until_ready(ae_forward(x_big, prep))
    assert out_big.shape == (300, input_size)
    assert jnp.allclose(out_big, ae_reference_bf16(x_big, params),
                        atol=5e-3, rtol=5e-3), "mismatch vs bf16 reference (big batch)"

    # Forced multi-step path: 300 rows / block_batch=128 -> 4 even grid steps
    # of 80 rows (exercises batch-ragged tiles and the megacore-balanced grid).
    out_big_tiled = jax.block_until_ready(ae_forward(x_big, prep, block_batch=128))
    assert out_big_tiled.shape == (300, input_size)
    assert jnp.allclose(out_big_tiled, out_big, atol=5e-3, rtol=5e-3), \
        "tiled vs single-step mismatch"

    print("KERNEL_OK")
</pallas_src>

<mosaic_0001>
module attributes {stable_mosaic.version = 11 : i64} {
  func.func @_probe_copy_kernel(%arg0: i32, %arg1: memref<8x128xf32, #tpu.memory_space<vmem>>, %arg2: memref<8x128xf32, #tpu.memory_space<vmem>>) attributes {dimension_semantics = [#tpu.dimension_semantics<arbitrary>], iteration_bounds = array<i64: 1>, scalar_prefetch = 0 : i64, scratch_operands = 0 : i64, tpu.core_type = #tpu.core_type<tc>, window_params = [{pipeline_mode = #tpu.pipeline_mode<synchronous>, transform_indices = @transform_0, window_bounds = array<i64: 8, 128>}, {pipeline_mode = #tpu.pipeline_mode<synchronous>, transform_indices = @transform_1, window_bounds = array<i64: 8, 128>}]} {
    %c0 = arith.constant 0 : index
    %c0_0 = arith.constant 0 : index
    %0 = vector.load %arg1[%c0, %c0_0] : memref<8x128xf32, #tpu.memory_space<vmem>>, vector<8x128xf32>
    %c0_1 = arith.constant 0 : index
    %c0_2 = arith.constant 0 : index
    %1 = vector.load %arg2[%c0_1, %c0_2] : memref<8x128xf32, #tpu.memory_space<vmem>>, vector<8x128xf32>
    tpu.vector_store %arg2[%c0_1, %c0_2], %0 {strides = array<i32>} : memref<8x128xf32, #tpu.memory_space<vmem>>, vector<8x128xf32>,
    return
  }
  func.func @transform_0(%arg0: i32) -> (i32, i32) {
    %c0_i32 = arith.constant 0 : i32
    %c0_i32_0 = arith.constant 0 : i32
    %c0_i32_1 = arith.constant 0 : i32
    return %c0_i32, %c0_i32_0 : i32, i32
  }
  func.func @transform_1(%arg0: i32) -> (i32, i32) {
    %c0_i32 = arith.constant 0 : i32
    %c0_i32_0 = arith.constant 0 : i32
    %c0_i32_1 = arith.constant 0 : i32
    return %c0_i32, %c0_i32_0 : i32, i32
  }
}

module attributes {stable_mosaic.version = 11 : i64} {
  func.func @ae_kernel(%arg0: i32, %arg1: memref<8x64xf32, #tpu.memory_space<vmem>>, %arg2: memref<64x128xbf16, #tpu.memory_space<vmem>>, %arg3: memref<1x128xf32, #tpu.memory_space<vmem>>, %arg4: memref<128x128xbf16, #tpu.memory_space<vmem>>, %arg5: memref<1x128xf32, #tpu.memory_space<vmem>>, %arg6: memref<128x128xbf16, #tpu.memory_space<vmem>>, %arg7: memref<1x128xf32, #tpu.memory_space<vmem>>, %arg8: memref<128x128xbf16, #tpu.memory_space<vmem>>, %arg9: memref<1x128xf32, #tpu.memory_space<vmem>>, %arg10: memref<128x128xbf16, #tpu.memory_space<vmem>>, %arg11: memref<1x128xf32, #tpu.memory_space<vmem>>, %arg12: memref<8x128xf32, #tpu.memory_space<vmem>>) attributes {dimension_semantics = [#tpu.dimension_semantics<parallel>], iteration_bounds = array<i64: 1>, scalar_prefetch = 0 : i64, scratch_operands = 0 : i64, tpu.core_type = #tpu.core_type<tc>, window_params = [{transform_indices = @transform_0, window_bounds = array<i64: 8, 64>}, {pipeline_mode = #tpu.pipeline_mode<synchronous>, transform_indices = @transform_1, window_bounds = array<i64: 64, 128>}, {pipeline_mode = #tpu.pipeline_mode<synchronous>, transform_indices = @transform_2, window_bounds = array<i64: 1, 128>}, {pipeline_mode = #tpu.pipeline_mode<synchronous>, transform_indices = @transform_3, window_bounds = array<i64: 128, 128>}, {pipeline_mode = #tpu.pipeline_mode<synchronous>, transform_indices = @transform_4, window_bounds = array<i64: 1, 128>}, {pipeline_mode = #tpu.pipeline_mode<synchronous>, transform_indices = @transform_5, window_bounds = array<i64: 128, 128>}, {pipeline_mode = #tpu.pipeline_mode<synchronous>, transform_indices = @transform_6, window_bounds = array<i64: 1, 128>}, {pipeline_mode = #tpu.pipeline_mode<synchronous>, transform_indices = @transform_7, window_bounds = array<i64: 128, 128>}, {pipeline_mode = #tpu.pipeline_mode<synchronous>, transform_indices = @transform_8, window_bounds = array<i64: 1, 128>}, {pipeline_mode = #tpu.pipeline_mode<synchronous>, transform_indices = @transform_9, window_bounds = array<i64: 128, 128>}, {pipeline_mode = #tpu.pipeline_mode<synchronous>, transform_indices = @transform_10, window_bounds = array<i64: 1, 128>}, {transform_indices = @transform_11, window_bounds = array<i64: 8, 128>}]} {
    %c0 = arith.constant 0 : index
    %c0_0 = arith.constant 0 : index
    %0 = vector.load %arg1[%c0, %c0_0] : memref<8x64xf32, #tpu.memory_space<vmem>>, vector<8x64xf32>
    %1 = arith.truncf %0 : vector<8x64xf32> to vector<8x64xbf16>
    %c0_1 = arith.constant 0 : index
    %c0_2 = arith.constant 0 : index
    %2 = vector.load %arg2[%c0_1, %c0_2] : memref<64x128xbf16, #tpu.memory_space<vmem>>, vector<64x128xbf16>
    %cst = arith.constant dense<0.000000e+00> : vector<8x128xf32>
    %3 = tpu.matmul %1, %2, %cst {dimension_numbers = #tpu.dot_dimension_numbers<[1], [0], [0], [1], [0, 0, 1, 1], [], []>} : vector<8x64xbf16>, vector<64x128xbf16>, vector<8x128xf32> -> vector<8x128xf32>
    %c0_3 = arith.constant 0 : index
    %c0_4 = arith.constant 0 : index
    %4 = vector.load %arg3[%c0_3, %c0_4] : memref<1x128xf32, #tpu.memory_space<vmem>>, vector<1x128xf32>
    %5 = vector.broadcast %4 : vector<1x128xf32> to vector<8x128xf32>
    %6 = arith.addf %3, %5 : vector<8x128xf32>
    %cst_5 = arith.constant 0.000000e+00 : f32
    %7 = vector.broadcast %cst_5 : f32 to vector<8x128xf32>
    %8 = arith.maximumf %6, %7 : vector<8x128xf32>
    %9 = arith.truncf %8 : vector<8x128xf32> to vector<8x128xbf16>
    %c0_6 = arith.constant 0 : index
    %c0_7 = arith.constant 0 : index
    %10 = vector.load %arg4[%c0_6, %c0_7] : memref<128x128xbf16, #tpu.memory_space<vmem>>, vector<128x128xbf16>
    %cst_8 = arith.constant dense<0.000000e+00> : vector<8x128xf32>
    %11 = tpu.matmul %9, %10, %cst_8 {dimension_numbers = #tpu.dot_dimension_numbers<[1], [0], [0], [1], [0, 0, 1, 1], [], []>} : vector<8x128xbf16>, vector<128x128xbf16>, vector<8x128xf32> -> vector<8x128xf32>
    %c0_9 = arith.constant 0 : index
    %c0_10 = arith.constant 0 : index
    %12 = vector.load %arg5[%c0_9, %c0_10] : memref<1x128xf32, #tpu.memory_space<vmem>>, vector<1x128xf32>
    %13 = vector.broadcast %12 : vector<1x128xf32> to vector<8x128xf32>
    %14 = arith.addf %11, %13 : vector<8x128xf32>
    %cst_11 = arith.constant 0.000000e+00 : f32
    %15 = vector.broadcast %cst_11 : f32 to vector<8x128xf32>
    %16 = arith.maximumf %14, %15 : vector<8x128xf32>
    %17 = arith.truncf %16 : vector<8x128xf32> to vector<8x128xbf16>
    %c0_12 = arith.constant 0 : index
    %c0_13 = arith.constant 0 : index
    %18 = vector.load %arg6[%c0_12, %c0_13] : memref<128x128xbf16, #tpu.memory_space<vmem>>, vector<128x128xbf16>
    %cst_14 = arith.constant dense<0.000000e+00> : vector<8x128xf32>
    %19 = tpu.matmul %17, %18, %cst_14 {dimension_numbers = #tpu.dot_dimension_numbers<[1], [0], [0], [1], [0, 0, 1, 1], [], []>} : vector<8x128xbf16>, vector<128x128xbf16>, vector<8x128xf32> -> vector<8x128xf32>
    %c0_15 = arith.constant 0 : index
    %c0_16 = arith.constant 0 : index
    %20 = vector.load %arg7[%c0_15, %c0_16] : memref<1x128xf32, #tpu.memory_space<vmem>>, vector<1x128xf32>
    %21 = vector.broadcast %20 : vector<1x128xf32> to vector<8x128xf32>
    %22 = arith.addf %19, %21 : vector<8x128xf32>
    %cst_17 = arith.constant 0.000000e+00 : f32
    %23 = vector.broadcast %cst_17 : f32 to vector<8x128xf32>
    %24 = arith.maximumf %22, %23 : vector<8x128xf32>
    %25 = arith.truncf %24 : vector<8x128xf32> to vector<8x128xbf16>
    %c0_18 = arith.constant 0 : index
    %c0_19 = arith.constant 0 : index
    %26 = vector.load %arg8[%c0_18, %c0_19] : memref<128x128xbf16, #tpu.memory_space<vmem>>, vector<128x128xbf16>
    %cst_20 = arith.constant dense<0.000000e+00> : vector<8x128xf32>
    %27 = tpu.matmul %25, %26, %cst_20 {dimension_numbers = #tpu.dot_dimension_numbers<[1], [0], [0], [1], [0, 0, 1, 1], [], []>} : vector<8x128xbf16>, vector<128x128xbf16>, vector<8x128xf32> -> vector<8x128xf32>
    %c0_21 = arith.constant 0 : index
    %c0_22 = arith.constant 0 : index
    %28 = vector.load %arg9[%c0_21, %c0_22] : memref<1x128xf32, #tpu.memory_space<vmem>>, vector<1x128xf32>
    %29 = vector.broadcast %28 : vector<1x128xf32> to vector<8x128xf32>
    %30 = arith.addf %27, %29 : vector<8x128xf32>
    %cst_23 = arith.constant 0.000000e+00 : f32
    %31 = vector.broadcast %cst_23 : f32 to vector<8x128xf32>
    %32 = arith.maximumf %30, %31 : vector<8x128xf32>
    %33 = arith.truncf %32 : vector<8x128xf32> to vector<8x128xbf16>
    %c0_24 = arith.constant 0 : index
    %c0_25 = arith.constant 0 : index
    %34 = vector.load %arg10[%c0_24, %c0_25] : memref<128x128xbf16, #tpu.memory_space<vmem>>, vector<128x128xbf16>
    %cst_26 = arith.constant dense<0.000000e+00> : vector<8x128xf32>
    %35 = tpu.matmul %33, %34, %cst_26 {dimension_numbers = #tpu.dot_dimension_numbers<[1], [0], [0], [1], [0, 0, 1, 1], [], []>} : vector<8x128xbf16>, vector<128x128xbf16>, vector<8x128xf32> -> vector<8x128xf32>
    %c0_27 = arith.constant 0 : index
    %c0_28 = arith.constant 0 : index
    %36 = vector.load %arg11[%c0_27, %c0_28] : memref<1x128xf32, #tpu.memory_space<vmem>>, vector<1x128xf32>
    %37 = vector.broadcast %36 : vector<1x128xf32> to vector<8x128xf32>
    %38 = arith.addf %35, %37 : vector<8x128xf32>
    %c0_29 = arith.constant 0 : index
    %c0_30 = arith.constant 0 : index
    %39 = vector.load %arg12[%c0_29, %c0_30] : memref<8x128xf32, #tpu.memory_space<vmem>>, vector<8x128xf32>
    tpu.vector_store %arg12[%c0_29, %c0_30], %38 {strides = array<i32>} : memref<8x128xf32, #tpu.memory_space<vmem>>, vector<8x128xf32>,
    return
  }
  func.func @transform_0(%arg0: i32) -> (i32, i32) {
    %c0_i32 = arith.constant 0 : i32
    %c0_i32_0 = arith.constant 0 : i32
    return %arg0, %c0_i32 : i32, i32
  }
  func.func @transform_1(%arg0: i32) -> (i32, i32) {
    %c0_i32 = arith.constant 0 : i32
    %c0_i32_0 = arith.constant 0 : i32
    %c0_i32_1 = arith.constant 0 : i32
    return %c0_i32, %c0_i32_0 : i32, i32
  }
  func.func @transform_2(%arg0: i32) -> (i32, i32) {
    %c0_i32 = arith.constant 0 : i32
    %c0_i32_0 = arith.constant 0 : i32
    %c0_i32_1 = arith.constant 0 : i32
    return %c0_i32, %c0_i32_0 : i32, i32
  }
  func.func @transform_3(%arg0: i32) -> (i32, i32) {
    %c0_i32 = arith.constant 0 : i32
    %c0_i32_0 = arith.constant 0 : i32
    %c0_i32_1 = arith.constant 0 : i32
    return %c0_i32, %c0_i32_0 : i32, i32
  }
  func.func @transform_4(%arg0: i32) -> (i32, i32) {
    %c0_i32 = arith.constant 0 : i32
    %c0_i32_0 = arith.constant 0 : i32
    %c0_i32_1 = arith.constant 0 : i32
    return %c0_i32, %c0_i32_0 : i32, i32
  }
  func.func @transform_5(%arg0: i32) -> (i32, i32) {
    %c0_i32 = arith.constant 0 : i32
    %c0_i32_0 = arith.constant 0 : i32
    %c0_i32_1 = arith.constant 0 : i32
    return %c0_i32, %c0_i32_0 : i32, i32
  }
  func.func @transform_6(%arg0: i32) -> (i32, i32) {
    %c0_i32 = arith.constant 0 : i32
    %c0_i32_0 = arith.constant 0 : i32
    %c0_i32_1 = arith.constant 0 : i32
    return %c0_i32, %c0_i32_0 : i32, i32
  }
  func.func @transform_7(%arg0: i32) -> (i32, i32) {
    %c0_i32 = arith.constant 0 : i32
    %c0_i32_0 = arith.constant 0 : i32
    %c0_i32_1 = arith.constant 0 : i32
    return %c0_i32, %c0_i32_0 : i32, i32
  }
  func.func @transform_8(%arg0: i32) -> (i32, i32) {
    %c0_i32 = arith.constant 0 : i32
    %c0_i32_0 = arith.constant 0 : i32
    %c0_i32_1 = arith.constant 0 : i32
    return %c0_i32, %c0_i32_0 : i32, i32
  }
  func.func @transform_9(%arg0: i32) -> (i32, i32) {
    %c0_i32 = arith.constant 0 : i32
    %c0_i32_0 = arith.constant 0 : i32
    %c0_i32_1 = arith.constant 0 : i32
    return %c0_i32, %c0_i32_0 : i32, i32
  }
  func.func @transform_10(%arg0: i32) -> (i32, i32) {
    %c0_i32 = arith.constant 0 : i32
    %c0_i32_0 = arith.constant 0 : i32
    %c0_i32_1 = arith.constant 0 : i32
    return %c0_i32, %c0_i32_0 : i32, i32
  }
  func.func @transform_11(%arg0: i32) -> (i32, i32) {
    %c0_i32 = arith.constant 0 : i32
    %c0_i32_0 = arith.constant 0 : i32
    return %arg0, %c0_i32 : i32, i32
  }
}

</mosaic_0001>

<bundles_post_ra>
// kernel: tpu_custom_call.1
= control target key start
LH: loop header
LB: loop body
LE: loop exit
PB: predicated region body
PF: predicated region fallthrough
CT: control target
= control target key end

     0   :  { %6 = vsyncpa [#allocation3], 0  ;;  %s124_s0 = inlined_call_operand.hbm [shape: f32[8,128], index: 0, kind: input, shape index: {}]   ;;  %s125_s1 = inlined_call_operand.hbm [shape: f32[8,128], index: 1, kind: output, shape index: {}]  }
   0x1   :  { %7 = vsyncpa [#allocation4], 0  ;;  %s88_s6 = smov [#allocation2]   ;;  %s40_s10 = scalar_lea.hbm %s124_s0, 128 }
   0x2   :  { %s14_s7 = sshll.u32 %s88_s6, 4  ;;  %p41_p0 = scmp.ne.s32.totalorder %s124_s0, %s40_s10  ;;  %s15_s7 = int_to_ptr.vmem [resolvable:$true] %s14_s7 }
   0x3   :  { %p44_p1 = scmp.lt.u32.totalorder %s40_s10, %s124_s0 }
   0x5   :  { %p46_p2 = pnand %p44_p1, %p41_p0 }
   0x7   :  { %49 = shalt.err (!%p46_p2)
}
   0x8   :  { %s50_s15 = scalar_lea.vmem %s15_s7, 128  ;;  %p55_p4 = scmp.lt.s32.totalorder %s15_s7, %s15_s7 }
   0x9   :  { %p51_p3 = scmp.ne.s32.totalorder %s15_s7, %s50_s15  ;;  %p56_p5 = scmp.lt.s32.totalorder %s50_s15, %s50_s15 }
   0xb   :  { %p57_p6 = por %p56_p5, %p55_p4 }
   0xd   :  { %p58_p7 = pnand %p57_p6, %p51_p3 }
   0xf   :  { %61 = shalt.err (!%p58_p7)
}
  0x10   :  { %17 = dma.hbm_to_vmem [thread:$0]  %s124_s0, 128, %s15_s7, [#allocation3]  }
  0x11   :  { %84 = dma.done.wait [#allocation3], 128  }
  0x12   :  { %85 = vsyncadd [#allocation3], 4294967168  ;;  %s89_s18 = smov [#allocation5]   ;;  %v21_v0 = vld [vmem:[#allocation2] sm:$0xff] }
  0x13   :  { %s29_s19 = sshll.u32 %s89_s18, 4  ;;  %22 = vst [vmem:[#allocation5] sm:$0xff] %v21_v0  ;;  %s30_s19 = int_to_ptr.vmem [resolvable:$true] %s29_s19 }
  0x14   :  { %s62_s20 = scalar_lea.vmem %s30_s19, 128  ;;  %p67_p9 = scmp.lt.s32.totalorder %s30_s19, %s30_s19 }
  0x15   :  { %p63_p8 = scmp.ne.s32.totalorder %s30_s19, %s62_s20  ;;  %p68_p10 = scmp.lt.s32.totalorder %s62_s20, %s62_s20 }
  0x17   :  { %p69_p11 = por %p68_p10, %p67_p9 }
  0x19   :  { %p70_p12 = pnand %p69_p11, %p63_p8 }
  0x1b   :  { %73 = shalt.err (!%p70_p12)
}
  0x1c   :  { %s74_s23 = scalar_lea.hbm %s125_s1, 128 }
  0x1d   :  { %p75_p13 = scmp.ne.s32.totalorder %s125_s1, %s74_s23  ;;  %p78_p0 = scmp.lt.u32.totalorder %s74_s23, %s125_s1 }
  0x1f   :  { %p80_p1 = pnand %p78_p0, %p75_p13 }
  0x21   :  { %83 = shalt.err (!%p80_p1)
}
  0x22   :  { %32 = dma.vmem_to_hbm [thread:$0]  %s30_s19, 128, %s125_s1, [#allocation4]  }
  0x23   :  { %86 = dma.done.wait [#allocation4], 128  }
  0x24   :  { %87 = vsyncadd [#allocation4], 4294967168 }
  0x25   :  { %36 = vsyncpa [#allocation3], 1 }
  0x26   :  { %37 = vsyncpa [#allocation4], 1 }

// kernel: _ae_call.1
= control target key start
LH: loop header
LB: loop body
LE: loop exit
PB: predicated region body
PF: predicated region fallthrough
CT: control target
= control target key end

     0   :  { %16 = vsyncpa [#allocation3], 0  ;;  %s1307_s0 = inlined_call_operand.hbm [shape: f32[2,64], index: 0, kind: input, shape index: {}]   ;;  %s1308_s1 = inlined_call_operand.hbm [shape: bf16[64,128], index: 1, kind: input, shape index: {}]   ;;  %s1309_s2 = inlined_call_operand.vmem [shape: f32[1,128], index: 2, kind: input, shape index: {}]   ;;  %s1310_s3 = inlined_call_operand.hbm [shape: bf16[128,128], index: 3, kind: input, shape index: {}]   ;;  %s1311_s4 = inlined_call_operand.vmem [shape: f32[1,128], index: 4, kind: input, shape index: {}]   ;;  %s1312_s5 = inlined_call_operand.hbm [shape: bf16[128,128], index: 5, kind: input, shape index: {}]   ;;  %s1313_s6 = inlined_call_operand.vmem [shape: f32[1,128], index: 6, kind: input, shape index: {}]   ;;  %s1314_s7 = inlined_call_operand.hbm [shape: bf16[128,128], index: 7, kind: input, shape index: {}]   ;;  %s1315_s8 = inlined_call_operand.vmem [shape: f32[1,128], index: 8, kind: input, shape index: {}]   ;;  %s1316_s9 = inlined_call_operand.hbm [shape: bf16[128,128], index: 9, kind: input, shape index: {}]   ;;  %s1317_s10 = inlined_call_operand.vmem [shape: f32[1,128], index: 10, kind: input, shape index: {}]   ;;  %s1318_s11 = inlined_call_operand.hbm [shape: f32[2,128], index: 11, kind: output, shape index: {}]  }
   0x1   :  { %17 = vsyncpa [#allocation6], 0 }
   0x2   :  { %18 = vsyncpa [#allocation9], 0 }
   0x3   :  { %19 = vsyncpa [#allocation12], 0 }
   0x4   :  { %20 = vsyncpa [#allocation4], 0 }
   0x5   :  { %25 = vsyncadd [#allocation3], 96  ;;  %s1068_s17 = smov [#allocation5]   ;;  %s904_s21 = scalar_lea.hbm %s1308_s1, 512 }
   0x6   :  { %s38_s18 = sshll.u32 %s1068_s17, 4  ;;  %p905_p0 = scmp.ne.s32.totalorder %s1308_s1, %s904_s21  ;;  %s39_s18 = int_to_ptr.vmem [resolvable:$true] %s38_s18 }
   0x7   :  { %p908_p1 = scmp.lt.u32.totalorder %s904_s21, %s1308_s1 }
   0x9   :  { %p910_p2 = pnand %p908_p1, %p905_p0 }
   0xb   :  { %913 = shalt.err (!%p910_p2)
}
   0xc   :  { %s914_s26 = scalar_lea.vmem %s39_s18, 512  ;;  %p919_p4 = scmp.lt.s32.totalorder %s39_s18, %s39_s18 }
   0xd   :  { %p915_p3 = scmp.ne.s32.totalorder %s39_s18, %s914_s26  ;;  %p920_p5 = scmp.lt.s32.totalorder %s914_s26, %s914_s26 }
   0xf   :  { %p921_p6 = por %p920_p5, %p919_p4 }
  0x11   :  { %p922_p7 = pnand %p921_p6, %p915_p3 }
  0x13   :  { %925 = shalt.err (!%p922_p7)
}
  0x14   :  { %s1069_s27 = smov 64   ;;  %s1070_s28 = smov 4  }
  0x15   :  { %44 = dma.hbm_to_vmem [thread:$0]  %s1308_s1, 512, %s39_s18, [#allocation6], %s1069_s27, %s1069_s27, %s1070_s28  }
  0x16   :  { %s1071_s12 = smov [#allocation8]   ;;  %s1072_s14 = smov [#allocation2]  }
  0x17   :  { %s66_s13 = sshll.u32 %s1071_s12, 4  ;;  %s26_s15 = sshll.u32 %s1072_s14, 4  ;;  %s67_s13 = int_to_ptr.vmem [resolvable:$true] %s66_s13  ;;  %s27_s15 = int_to_ptr.vmem [resolvable:$true] %s26_s15 }
  0x18   :  { %s926_s19 = scalar_lea.hbm %s1312_s5, 1024 }
  0x19   :  { %p927_p8 = scmp.ne.s32.totalorder %s1312_s5, %s926_s19  ;;  %p930_p9 = scmp.lt.u32.totalorder %s926_s19, %s1312_s5 }
  0x1b   :  { %p932_p10 = pnand %p930_p9, %p927_p8 }
  0x1d   :  { %935 = shalt.err (!%p932_p10)
}
  0x1e   :  { %s936_s1 = scalar_lea.vmem %s67_s13, 1024  ;;  %p941_p12 = scmp.lt.s32.totalorder %s67_s13, %s67_s13 }
  0x1f   :  { %p937_p11 = scmp.ne.s32.totalorder %s67_s13, %s936_s1  ;;  %p942_p13 = scmp.lt.s32.totalorder %s936_s1, %s936_s1 }
  0x21   :  { %p943_p0 = por %p942_p13, %p941_p12 }
  0x23   :  { %p944_p1 = pnand %p943_p0, %p937_p11 }
  0x25   :  { %947 = shalt.err (!%p944_p1)
}
  0x26   :  { %72 = dma.hbm_to_vmem [thread:$0]  %s1312_s5, 1024, %s67_s13, [#allocation9], %s1069_s27, %s1069_s27, %s1070_s28  }
  0x27   :  { %s948_s29 = scalar_lea.hbm %s1307_s0, 32 }
  0x28   :  { %p949_p2 = scmp.ne.s32.totalorder %s1307_s0, %s948_s29  ;;  %p952_p3 = scmp.lt.u32.totalorder %s948_s29, %s1307_s0 }
  0x2a   :  { %p954_p4 = pnand %p952_p3, %p949_p2 }
  0x2c   :  { %957 = shalt.err (!%p954_p4)
}
  0x2d   :  { %s958_s17 = scalar_lea.vmem %s27_s15, 32  ;;  %s962_s19 = scalar_lea.vmem %s27_s15, 128 }
  0x2e   :  { %p959_p5 = scmp.ne.s32.totalorder %s27_s15, %s958_s17  ;;  %p963_p6 = scmp.lt.s32.totalorder %s27_s15, %s27_s15 }
  0x2f   :  { %p964_p7 = scmp.lt.s32.totalorder %s962_s19, %s958_s17 }
  0x31   :  { %p965_p8 = por %p964_p7, %p963_p6 }
  0x33   :  { %p966_p9 = pnand %p965_p8, %p959_p5 }
  0x35   :  { %969 = shalt.err (!%p966_p9)
}
  0x36   :  { %s1073_s5 = smov 32   ;;  %s1074_s13 = smov 2  }
  0x37   :  { %32 = dma.hbm_to_vmem [thread:$0]  %s1307_s0, 32, %s27_s15, [#allocation3], %s1073_s5, %s1073_s5, %s1074_s13  }
  0x38   :  { %s1075_s22 = smov [#allocation7]   ;;  %s1076_s1 = smov [#allocation10]  }
  0x39   :  { %s52_s23 = sshll.u32 %s1075_s22, 4  ;;  %s80_s18 = sshll.u32 %s1076_s1, 4  ;;  %s53_s23 = int_to_ptr.vmem [resolvable:$true] %s52_s23  ;;  %s81_s18 = int_to_ptr.vmem [resolvable:$true] %s80_s18 }
  0x3a   :  { %s970_s26 = scalar_lea.hbm %s1310_s3, 1024 }
  0x3b   :  { %p971_p10 = scmp.ne.s32.totalorder %s1310_s3, %s970_s26  ;;  %p974_p11 = scmp.lt.u32.totalorder %s970_s26, %s1310_s3 }
  0x3d   :  { %p976_p12 = pnand %p974_p11, %p971_p10 }
  0x3f   :  { %979 = shalt.err (!%p976_p12)
}
  0x40   :  { %s980_s0 = scalar_lea.vmem %s53_s23, 1024  ;;  %p985_p0 = scmp.lt.s32.totalorder %s53_s23, %s53_s23 }
  0x41   :  { %p981_p13 = scmp.ne.s32.totalorder %s53_s23, %s980_s0  ;;  %p986_p1 = scmp.lt.s32.totalorder %s980_s0, %s980_s0 }
  0x43   :  { %p987_p2 = por %p986_p1, %p985_p0 }
  0x45   :  { %p988_p3 = pnand %p987_p2, %p981_p13 }
  0x47   :  { %991 = shalt.err (!%p988_p3)
}
  0x48   :  { %58 = dma.hbm_to_vmem [thread:$0]  %s1310_s3, 1024, %s53_s23, [#allocation6], %s1069_s27, %s1069_s27, %s1070_s28  }
  0x49   :  { %s992_s20 = scalar_lea.hbm %s1314_s7, 1024 }
  0x4a   :  { %p993_p4 = scmp.ne.s32.totalorder %s1314_s7, %s992_s20  ;;  %p996_p5 = scmp.lt.u32.totalorder %s992_s20, %s1314_s7 }
  0x4c   :  { %p998_p6 = pnand %p996_p5, %p993_p4 }
  0x4e   :  { %1001 = shalt.err (!%p998_p6)
}
  0x4f   :  { %s1002_s25 = scalar_lea.vmem %s81_s18, 1024  ;;  %p1007_p8 = scmp.lt.s32.totalorder %s81_s18, %s81_s18 }
  0x50   :  { %p1003_p7 = scmp.ne.s32.totalorder %s81_s18, %s1002_s25  ;;  %p1008_p9 = scmp.lt.s32.totalorder %s1002_s25, %s1002_s25 }
  0x52   :  { %p1009_p10 = por %p1008_p9, %p1007_p8 }
  0x54   :  { %p1010_p11 = pnand %p1009_p10, %p1003_p7 }
  0x56   :  { %1013 = shalt.err (!%p1010_p11)
}
  0x57   :  { %86 = dma.hbm_to_vmem [thread:$0]  %s1314_s7, 1024, %s81_s18, [#allocation9], %s1069_s27, %s1069_s27, %s1070_s28  }
  0x58   :  { %s1077_s26 = smov [#allocation11]   ;;  %s1014_s14 = scalar_lea.hbm %s1316_s9, 1024 }
  0x59   :  { %s94_s29 = sshll.u32 %s1077_s26, 4  ;;  %p1015_p12 = scmp.ne.s32.totalorder %s1316_s9, %s1014_s14  ;;  %s95_s29 = int_to_ptr.vmem [resolvable:$true] %s94_s29 }
  0x5a   :  { %p1018_p13 = scmp.lt.u32.totalorder %s1014_s14, %s1316_s9 }
  0x5c   :  { %p1020_p0 = pnand %p1018_p13, %p1015_p12 }
  0x5e   :  { %1023 = shalt.err (!%p1020_p0)
}
  0x5f   :  { %s1024_s19 = scalar_lea.vmem %s95_s29, 1024  ;;  %p1029_p2 = scmp.lt.s32.totalorder %s95_s29, %s95_s29 }
  0x60   :  { %p1025_p1 = scmp.ne.s32.totalorder %s95_s29, %s1024_s19  ;;  %p1030_p3 = scmp.lt.s32.totalorder %s1024_s19, %s1024_s19 }
  0x62   :  { %p1031_p4 = por %p1030_p3, %p1029_p2 }
  0x64   :  { %p1032_p5 = pnand %p1031_p4, %p1025_p1 }
  0x66   :  { %1035 = shalt.err (!%p1032_p5)
}
  0x67   :  { %100 = dma.hbm_to_vmem [thread:$0]  %s1316_s9, 1024, %s95_s29, [#allocation12], %s1069_s27, %s1069_s27, %s1070_s28  }
  0x68   :  { %1058 = dma.done.wait [#allocation3], 128  }
  0x69   :  { %1059 = vsyncadd [#allocation3], 4294967168 }
  0x6a   :  { %1060 = dma.done.wait [#allocation6], 1536  }
  0x6b   :  { %1061 = vsyncadd [#allocation6], 4294965760 }
  0x6c   :  { %1062 = dma.done.wait [#allocation9], 2048  }
  0x6d   :  { %1063 = vsyncadd [#allocation9], 4294965248 }
  0x6e   :  { %1064 = dma.done.wait [#allocation12], 1024  }
  0x6f   :  { %1065 = vsyncadd [#allocation12], 4294966272  ;;  %v1078_v0 = vmov 0.0   ;;  %vm1079_vm0 = vmmov 0   ;;  %v868_v1 = vld [vmem:[#allocation5] sm:$0xff]   ;;  %v869_v2 = vld [vmem:[#allocation5 + $0x8] sm:$0xff]  }
  0x70   :  { %763 = vmatprep.subr.bf16.mxu0 %v1078_v0  ;;  %771 = vmatprep.mubr.msk.bf16.mxu0 %vm1079_vm0, %v1078_v0  ;;  %v872_v3 = vld [vmem:[#allocation7] sm:$0xff]   ;;  %v870_v4 = vld [vmem:[#allocation5 + $0x10] sm:$0xff]   ;;  %v873_v5 = vld [vmem:[#allocation7 + $0x8] sm:$0xff]   ;;  %vm163_vm1 = vcmask 523264  }
  0x71   :  { %775 = vmatprep.subr.bf16.mxu1 %v1078_v0  ;;  %791 = vmatprep.mubr.msk.bf16.mxu1 %vm1079_vm0, %v1078_v0  ;;  %v871_v6 = vld [vmem:[#allocation5 + $0x18] sm:$0xff]   ;;  %v874_v8 = vld [vmem:[#allocation7 + $0x10] sm:$0xff]   ;;  %v876_v11 = vld [vmem:[#allocation7 + $0x20] sm:$0xff]  }
  0x72   :  { %764 = vmatpush3.bf16.msra.mxu0 %v868_v1  ;;  %776 = vmatpush3.bf16.msra.mxu1 %v872_v3  ;;  %v122_v7 = vld [vmem:[#allocation2] sm:$0xff]  ;;  %v877_v12 = vld [vmem:[#allocation7 + $0x28] sm:$0xff]   ;;  %v878_v13 = vld [vmem:[#allocation7 + $0x30] sm:$0xff]  }
  0x73   :  { %765 = vmatprep.subr.bf16.mxu0 %v1078_v0  ;;  %777 = vmatprep.subr.bf16.mxu1 %v1078_v0  ;;  %v123_v9 = vpack.c.bf16 %v122_v7, %v122_v7  ;;  %v875_v10 = vld [vmem:[#allocation7 + $0x18] sm:$0xff]   ;;  %v880_v15 = vld [vmem:[#allocation8] sm:$0xff]   ;;  %v881_v16 = vld [vmem:[#allocation8 + $0x8] sm:$0xff]  }
  0x74   :  { %v879_v14 = vld [vmem:[#allocation7 + $0x38] sm:$0xff]   ;;  %v882_v17 = vld [vmem:[#allocation8 + $0x10] sm:$0xff]   ;;  %v884_v19 = vld [vmem:[#allocation8 + $0x20] sm:$0xff]  }
  0x75   :  { %v883_v18 = vld [vmem:[#allocation8 + $0x18] sm:$0xff]   ;;  %v885_v20 = vld [vmem:[#allocation8 + $0x28] sm:$0xff]   ;;  %v886_v29 = vld [vmem:[#allocation8 + $0x30] sm:$0xff]  }
  0x76   :  { %766 = vmatpush3.bf16.msra.mxu0 %v869_v2  ;;  %778 = vmatpush3.bf16.msra.mxu1 %v873_v5  ;;  %v680_v21 = vld [vmem:[%s1309_s2] ss:$0 sm:$0xff]  ;;  %v888_v31 = vld [vmem:[#allocation10] sm:$0xff]   ;;  %v889_v32 = vld [vmem:[#allocation10 + $0x8] sm:$0xff]  }
  0x77   :  { %767 = vmatprep.subr.bf16.mxu0 %v1078_v0  ;;  %779 = vmatprep.subr.bf16.mxu1 %v1078_v0  ;;  %v887_v30 = vld [vmem:[#allocation8 + $0x38] sm:$0xff]   ;;  %v890_v33 = vld [vmem:[#allocation10 + $0x10] sm:$0xff]   ;;  %v892_v35 = vld [vmem:[#allocation10 + $0x20] sm:$0xff]  }
  0x78   :  { %v891_v34 = vld [vmem:[#allocation10 + $0x18] sm:$0xff]   ;;  %v893_v36 = vld [vmem:[#allocation10 + $0x28] sm:$0xff]   ;;  %v894_v45 = vld [vmem:[#allocation10 + $0x30] sm:$0xff]  }
  0x79   :  { %v686_v37 = vld [vmem:[%s1311_s4] ss:$0 sm:$0xff]  ;;  %v896_v47 = vld [vmem:[#allocation11] sm:$0xff]   ;;  %v897_v48 = vld [vmem:[#allocation11 + $0x8] sm:$0xff]  }
  0x7a   :  { %768 = vmatpush3.bf16.msra.mxu0 %v870_v4  ;;  %780 = vmatpush3.bf16.msra.mxu1 %v874_v8  ;;  %v895_v46 = vld [vmem:[#allocation10 + $0x38] sm:$0xff]   ;;  %v898_v49 = vld [vmem:[#allocation11 + $0x10] sm:$0xff]   ;;  %v900_v51 = vld [vmem:[#allocation11 + $0x20] sm:$0xff]  }
  0x7b   :  { %769 = vmatprep.subr.bf16.mxu0 %v1078_v0  ;;  %781 = vmatprep.subr.bf16.mxu1 %v1078_v0  ;;  %v899_v50 = vld [vmem:[#allocation11 + $0x18] sm:$0xff]   ;;  %v901_v52 = vld [vmem:[#allocation11 + $0x28] sm:$0xff]   ;;  %v902_v61 = vld [vmem:[#allocation11 + $0x30] sm:$0xff]  }
  0x7c   :  { %v695_v53 = vld [vmem:[%s1313_s6] ss:$0 sm:$0xff] }
  0x7d   :  { %v903_v62 = vld [vmem:[#allocation11 + $0x38] sm:$0xff]  }
  0x7e   :  { %770 = vmatpush3.bf16.msra.mxu0 %v871_v6  ;;  %782 = vmatpush3.bf16.msra.mxu1 %v875_v10  ;;  %v704_v63 = vld [vmem:[%s1315_s8] ss:$0 sm:$0xff] }
  0x7f   :  { %795 = vmatprep.subr.bf16.mxu0 %v1078_v0  ;;  %783 = vmatprep.subr.bf16.mxu1 %v1078_v0  ;;  %v713_v8 = vld [vmem:[%s1317_s10] ss:$0 sm:$0xff] }
  0x81   :  { %772 = vmatmul.mubr.msk.bf16.vlgmr.msra.gmra.mrb[0].mxu0 %vm163_vm1, %v123_v9 }
  0x82   :  { %811 = vmatprep.mubr.msk.bf16.mxu0 %vm1079_vm0, %v1078_v0  ;;  %784 = vmatpush3.bf16.msra.mxu1 %v876_v11 }
  0x83   :  { %785 = vmatprep.subr.bf16.mxu1 %v1078_v0  ;;  %796 = vmatpush3.bf16.msra.mxu0 %v880_v15 }
  0x84   :  { %797 = vmatprep.subr.bf16.mxu0 %v1078_v0 }
  0x86   :  { %786 = vmatpush3.bf16.msra.mxu1 %v877_v12 }
  0x87   :  { %787 = vmatprep.subr.bf16.mxu1 %v1078_v0  ;;  %798 = vmatpush3.bf16.msra.mxu0 %v881_v16 }
  0x88   :  { %799 = vmatprep.subr.bf16.mxu0 %v1078_v0 }
  0x8a   :  { %788 = vmatpush3.bf16.msra.mxu1 %v878_v13 }
  0x8b   :  { %789 = vmatprep.subr.bf16.mxu1 %v1078_v0  ;;  %800 = vmatpush3.bf16.msra.mxu0 %v882_v17 }
  0x8c   :  { %801 = vmatprep.subr.bf16.mxu0 %v1078_v0 }
  0x8e   :  { %790 = vmatpush3.bf16.msra.mxu1 %v879_v14 }
  0x8f   :  { %815 = vmatprep.subr.bf16.mxu1 %v1078_v0  ;;  %802 = vmatpush3.bf16.msra.mxu0 %v883_v18 }
  0x90   :  { %803 = vmatprep.subr.bf16.mxu0 %v1078_v0 }
  0x93   :  { %804 = vmatpush3.bf16.msra.mxu0 %v884_v19 }
  0x94   :  { %805 = vmatprep.subr.bf16.mxu0 %v1078_v0 }
  0x97   :  { %806 = vmatpush3.bf16.msra.mxu0 %v885_v20 }
  0x98   :  { %807 = vmatprep.subr.bf16.mxu0 %v1078_v0 }
  0x9b   :  { %808 = vmatpush3.bf16.msra.mxu0 %v886_v29 }
  0x9c   :  { %809 = vmatprep.subr.bf16.mxu0 %v1078_v0 }
  0x9f   :  { %810 = vmatpush3.bf16.msra.mxu0 %v887_v30 }
  0xa0   :  { %835 = vmatprep.subr.bf16.mxu0 %v1078_v0 }
 0x154   :  { %v201_v22 = vpop.f32.mrb[0].mxu0 }
 0x155   :  { %v202_v23 = vadd.f32 %v680_v21, %v201_v22  ;;  %v773_v24 = vpop.f32.mrb[1].mxu0 }
 0x156   :  { %v204_v25 = vpop.f32.mrb[2].mxu0 }
 0x157   :  { %v207_v26 = vmax.f32 %v202_v23, 0.0  ;;  %v774_v27 = vpop.f32.mrb[3].mxu0 }
 0x159   :  { %v208_v28 = vpack.c.bf16 %v207_v26, %v207_v26 }
 0x15b   :  { %792 = vmatmul.mubr.bf16.vlgmr.msra.gmra.mrb[0].mxu1 %v208_v28 }
 0x15c   :  { %831 = vmatprep.mubr.msk.bf16.mxu1 %vm1079_vm0, %v1078_v0  ;;  %816 = vmatpush3.bf16.msra.mxu1 %v888_v31 }
 0x15d   :  { %817 = vmatprep.subr.bf16.mxu1 %v1078_v0 }
 0x160   :  { %818 = vmatpush3.bf16.msra.mxu1 %v889_v32 }
 0x161   :  { %819 = vmatprep.subr.bf16.mxu1 %v1078_v0 }
 0x164   :  { %820 = vmatpush3.bf16.msra.mxu1 %v890_v33 }
 0x165   :  { %821 = vmatprep.subr.bf16.mxu1 %v1078_v0 }
 0x168   :  { %822 = vmatpush3.bf16.msra.mxu1 %v891_v34 }
 0x169   :  { %823 = vmatprep.subr.bf16.mxu1 %v1078_v0 }
 0x16c   :  { %824 = vmatpush3.bf16.msra.mxu1 %v892_v35 }
 0x16d   :  { %825 = vmatprep.subr.bf16.mxu1 %v1078_v0 }
 0x170   :  { %826 = vmatpush3.bf16.msra.mxu1 %v893_v36 }
 0x171   :  { %827 = vmatprep.subr.bf16.mxu1 %v1078_v0 }
 0x174   :  { %828 = vmatpush3.bf16.msra.mxu1 %v894_v45 }
 0x175   :  { %829 = vmatprep.subr.bf16.mxu1 %v1078_v0 }
 0x178   :  { %830 = vmatpush3.bf16.msra.mxu1 %v895_v46 }
 0x22e   :  { %v314_v38 = vpop.f32.mrb[0].mxu1 }
 0x22f   :  { %v315_v39 = vadd.f32 %v686_v37, %v314_v38  ;;  %v793_v40 = vpop.f32.mrb[1].mxu1 }
 0x230   :  { %v317_v41 = vpop.f32.mrb[2].mxu1 }
 0x231   :  { %v320_v42 = vmax.f32 %v315_v39, 0.0  ;;  %v794_v43 = vpop.f32.mrb[3].mxu1 }
 0x233   :  { %v321_v44 = vpack.c.bf16 %v320_v42, %v320_v42 }
 0x235   :  { %812 = vmatmul.mubr.bf16.vlgmr.msra.gmra.mrb[4].mxu0 %v321_v44 }
 0x236   :  { %851 = vmatprep.mubr.msk.bf16.mxu0 %vm1079_vm0, %v1078_v0  ;;  %836 = vmatpush3.bf16.msra.mxu0 %v896_v47 }
 0x237   :  { %837 = vmatprep.subr.bf16.mxu0 %v1078_v0 }
 0x23a   :  { %838 = vmatpush3.bf16.msra.mxu0 %v897_v48 }
 0x23b   :  { %839 = vmatprep.subr.bf16.mxu0 %v1078_v0 }
 0x23e   :  { %840 = vmatpush3.bf16.msra.mxu0 %v898_v49 }
 0x23f   :  { %841 = vmatprep.subr.bf16.mxu0 %v1078_v0 }
 0x242   :  { %842 = vmatpush3.bf16.msra.mxu0 %v899_v50 }
 0x243   :  { %843 = vmatprep.subr.bf16.mxu0 %v1078_v0 }
 0x246   :  { %844 = vmatpush3.bf16.msra.mxu0 %v900_v51 }
 0x247   :  { %845 = vmatprep.subr.bf16.mxu0 %v1078_v0 }
 0x24a   :  { %846 = vmatpush3.bf16.msra.mxu0 %v901_v52 }
 0x24b   :  { %847 = vmatprep.subr.bf16.mxu0 %v1078_v0 }
 0x24e   :  { %848 = vmatpush3.bf16.msra.mxu0 %v902_v61 }
 0x24f   :  { %849 = vmatprep.subr.bf16.mxu0 %v1078_v0 }
 0x252   :  { %850 = vmatpush3.bf16.msra.mxu0 %v903_v62 }
 0x308   :  { %v427_v54 = vpop.f32.mrb[4].mxu0 }
 0x309   :  { %v428_v55 = vadd.f32 %v695_v53, %v427_v54  ;;  %v813_v56 = vpop.f32.mrb[5].mxu0 }
 0x30a   :  { %v430_v57 = vpop.f32.mrb[6].mxu0 }
 0x30b   :  { %v433_v58 = vmax.f32 %v428_v55, 0.0  ;;  %v814_v59 = vpop.f32.mrb[7].mxu0 }
 0x30d   :  { %v434_v60 = vpack.c.bf16 %v433_v58, %v433_v58 }
 0x30f   :  { %832 = vmatmul.mubr.bf16.vlgmr.msra.gmra.mrb[4].mxu1 %v434_v60 }
 0x3e2   :  { %v540_v1 = vpop.f32.mrb[4].mxu1 }
 0x3e3   :  { %v541_v2 = vadd.f32 %v704_v63, %v540_v1  ;;  %v833_v3 = vpop.f32.mrb[5].mxu1 }
 0x3e4   :  { %v543_v4 = vpop.f32.mrb[6].mxu1 }
 0x3e5   :  { %v546_v5 = vmax.f32 %v541_v2, 0.0  ;;  %v834_v6 = vpop.f32.mrb[7].mxu1 }
 0x3e7   :  { %v547_v7 = vpack.c.bf16 %v546_v5, %v546_v5 }
 0x3e9   :  { %852 = vmatmul.mubr.bf16.vlgmr.msra.gmra.mrb[8].mxu0 %v547_v7 }
 0x4bc   :  { %v653_v9 = vpop.f32.mrb[8].mxu0 }
 0x4bd   :  { %v654_v0 = vadd.f32 %v713_v8, %v653_v9  ;;  %v853_v10 = vpop.f32.mrb[9].mxu0 }
 0x4be   :  { %v656_v11 = vpop.f32.mrb[10].mxu0 }
 0x4bf   :  { %659 = vst [vmem:[#allocation13] sm:$0xff] %v654_v0  ;;  %v854_v12 = vpop.f32.mrb[11].mxu0 }
 0x4c0   :  { %664 = vsyncadd [#allocation4], 96  ;;  %s1080_s8 = smov [#allocation13]  }
 0x4c1   :  { %s665_s24 = sshll.u32 %s1080_s8, 4  ;;  %s666_s24 = int_to_ptr.vmem [resolvable:$true] %s665_s24 }
 0x4c2   :  { %s1036_s25 = scalar_lea.vmem %s666_s24, 32  ;;  %s1040_s3 = scalar_lea.vmem %s666_s24, 128 }
 0x4c3   :  { %p1037_p6 = scmp.ne.s32.totalorder %s666_s24, %s1036_s25  ;;  %p1041_p7 = scmp.lt.s32.totalorder %s666_s24, %s666_s24 }
 0x4c4   :  { %p1042_p8 = scmp.lt.s32.totalorder %s1040_s3, %s1036_s25 }
 0x4c6   :  { %p1043_p9 = por %p1042_p8, %p1041_p7 }
 0x4c8   :  { %p1044_p10 = pnand %p1043_p9, %p1037_p6 }
 0x4ca   :  { %1047 = shalt.err (!%p1044_p10)
}
 0x4cb   :  { %s1048_s26 = scalar_lea.hbm %s1318_s11, 32 }
 0x4cc   :  { %p1049_p11 = scmp.ne.s32.totalorder %s1318_s11, %s1048_s26  ;;  %p1052_p12 = scmp.lt.u32.totalorder %s1048_s26, %s1318_s11 }
 0x4ce   :  { %p1054_p13 = pnand %p1052_p12, %p1049_p11 }
 0x4d0   :  { %1057 = shalt.err (!%p1054_p13)
}
 0x4d1   :  { %671 = dma.vmem_to_hbm [thread:$0]  %s666_s24, 32, %s1318_s11, [#allocation4], %s1073_s5, %s1073_s5, %s1074_s13  }
 0x4d2   :  { %1066 = dma.done.wait [#allocation4], 128  }
 0x4d3   :  { %1067 = vsyncadd [#allocation4], 4294967168 }
 0x4d4   :  { %675 = vsyncpa [#allocation3], 1 }
 0x4d5   :  { %676 = vsyncpa [#allocation6], 1 }
 0x4d6   :  { %677 = vsyncpa [#allocation9], 1 }
 0x4d7   :  { %678 = vsyncpa [#allocation12], 1 }
 0x4d8   :  { %679 = vsyncpa [#allocation4], 1 }

</bundles_post_ra>
